<compile_context>
chip_gen: v6e
topology: v6e:2x2x1
jax: 0.10.0
libtpu: 0.0.40
codegen_flags: <defaults>
</compile_context>

<pallas_src>
import jax
import jax.numpy as jnp
from jax.experimental import pallas as pl
from jax.experimental.pallas import tpu as pltpu


_LANES = 128
_TILE_ROWS_MAX = 4096  # 4096 * 128 * 4 B = 2 MiB per input per block


def _round_up(x, m):
    return ((x + m - 1) // m) * m


# ---------------------------------------------------------------------------
# Pallas kernel: per-block masked squared-error partial sums.
#   mask = (rd finite) & (rd > 0) & (d > 0) [& row in-bounds, last block only]
#   num_partial[block] = sum over block of where(mask, (rd - d)^2, 0)
#   den_partial[block] = sum over block of mask
# Each block reduces its (tile_rows, 128) tile to an (8, 128) partial with
# pure vector adds; the tiny cross-lane finish happens in the wrapper.
# ---------------------------------------------------------------------------
def _make_masked_mse_kernel(valid_rows, tile_rows, need_row_mask):
    def kernel(rd_ref, d_ref, num_ref, den_ref):
        rd = rd_ref[...]
        d = d_ref[...]

        # Empty pixels are +inf (rasterizer sentinel); exclude with rd < inf.
        mask = (rd < jnp.inf) & (rd > 0.0) & (d > 0.0)

        if need_row_mask:
            # Grid does not divide the array: the last block's tail contains
            # unspecified data (DMA is clamped, nothing extra is read from
            # HBM).  Mask it off by global row index.
            row = (jax.lax.broadcasted_iota(jnp.int32, rd.shape, 0)
                   + pl.program_id(0) * tile_rows)
            mask = mask & (row < valid_rows)

        diff = rd - d
        sq = jnp.where(mask, diff * diff, 0.0)   # where() avoids inf/NaN leaks
        cnt = mask.astype(jnp.float32)

        tr = rd.shape[0]
        num_ref[0] = jnp.sum(sq.reshape(tr // 8, 8, _LANES), axis=0)
        den_ref[0] = jnp.sum(cnt.reshape(tr // 8, 8, _LANES), axis=0)

    return kernel


def masked_mse_pallas(render_depth, depth, *, tile_rows_max=_TILE_ROWS_MAX):
    """render_depth, depth: [B, H, W] float32 -> scalar loss."""
    assert render_depth.shape == depth.shape
    total = int(depth.size)

    rows = -(-total // _LANES)                      # cdiv to lane-dense rows
    rows8 = _round_up(rows, 8)                      # pad only to a vreg tile
    padded_total = rows8 * _LANES

    def _prep(x):
        x = x.reshape(-1).astype(jnp.float32)
        if padded_total != total:
            # Zero padding never satisfies (x > 0) -> mask False.  At most
            # 1023 elements; skipped entirely when total % 1024 == 0.
            x = jnp.pad(x, (0, padded_total - total))
        return x.reshape(rows8, _LANES)

    rd2 = _prep(render_depth)
    d2 = _prep(depth)

    tile_rows = min(_round_up(tile_rows_max, 8), rows8)
    grid = -(-rows8 // tile_rows)
    need_row_mask = (grid * tile_rows) != rows8

    kernel = _make_masked_mse_kernel(rows8, tile_rows, need_row_mask)

    num_p, den_p = pl.pallas_call(
        kernel,
        out_shape=(
            jax.ShapeDtypeStruct((grid, 8, _LANES), jnp.float32),
            jax.ShapeDtypeStruct((grid, 8, _LANES), jnp.float32),
        ),
        grid_spec=pltpu.PrefetchScalarGridSpec(
            num_scalar_prefetch=0,
            grid=(grid,),
            in_specs=[
                pl.BlockSpec((tile_rows, _LANES), lambda i: (i, 0)),
                pl.BlockSpec((tile_rows, _LANES), lambda i: (i, 0)),
            ],
            out_specs=[
                pl.BlockSpec((1, 8, _LANES), lambda i: (i, 0, 0)),
                pl.BlockSpec((1, 8, _LANES), lambda i: (i, 0, 0)),
            ],
        ),
        compiler_params=pltpu.CompilerParams(
            dimension_semantics=("parallel",),
        ),
    )(rd2, d2)

    num = jnp.sum(num_p)
    den = jnp.sum(den_p)
    # NOTE: den == 0 (no valid pixel) yields NaN, matching the PyTorch module.
    return num / den


# ---------------------------------------------------------------------------
# Plain-JAX glue: simple point-cloud depth rasterizer (zbuf analogue).
# Points are assumed to be in NDC-like coordinates: x, y in [-1, 1], z = depth.
# Empty pixels are left at +inf (masked out inside the Pallas kernel); this
# avoids an extra full-image cleanup pass over HBM.
# ---------------------------------------------------------------------------
def rasterize_depth(pred_pts, H, W):
    # TODO(synk): pytorch3d's radius-splatting rasterizer (radius=0.02, K
    # points per pixel) is not reproduced; this is a 1-pixel nearest-point
    # z-buffer.  For large N the serialized XLA scatter-min below is the real
    # end-to-end bottleneck - a sort-by-pixel + segment-min (or a Pallas
    # gather/scatter kernel with scalar-prefetched pixel indices) would be the
    # next optimization.
    B, N, _ = pred_pts.shape
    x = pred_pts[..., 0]
    y = pred_pts[..., 1]
    z = pred_pts[..., 2]
    px = jnp.clip(jnp.round((x + 1.0) * 0.5 * (W - 1)).astype(jnp.int32), 0, W - 1)
    py = jnp.clip(jnp.round((y + 1.0) * 0.5 * (H - 1)).astype(jnp.int32), 0, H - 1)
    in_view = (jnp.abs(x) <= 1.0) & (jnp.abs(y) <= 1.0) & (z > 0.0)
    z_valid = jnp.where(in_view, z, jnp.inf)
    bidx = jnp.broadcast_to(jnp.arange(B, dtype=jnp.int32)[:, None], (B, N))
    zbuf = jnp.full((B, H, W), jnp.inf, dtype=jnp.float32)
    zbuf = zbuf.at[bidx, py, px].min(z_valid)
    return zbuf  # empty pixels stay +inf; kernel mask excludes them


def rendering_loss(pred_pts, depth):
    """RenderingLoss.forward equivalent.

    pred_pts: [B, N, 3] float32 point cloud
    depth:    [B, H, W] float32 ground-truth depth map
    returns:  scalar float32 loss
    """
    B, H, W = depth.shape
    render_depth = rasterize_depth(pred_pts, H, W)
    return masked_mse_pallas(render_depth, depth)


def _ref_loss(render_depth, depth):
    mask = (render_depth < jnp.inf) & (render_depth > 0) & (depth > 0)
    num = jnp.sum(jnp.where(mask, (render_depth - depth) ** 2, 0.0))
    den = jnp.sum(mask.astype(jnp.float32))
    return num / den


if __name__ == "__main__":
    key = jax.random.PRNGKey(0)
    k1, k2, k3, k4, k5, k6, k7 = jax.random.split(key, 7)

    # ---- main end-to-end test (matches the module's forward) ----
    B, N, H, W = 2, 64, 16, 16
    xy = jax.random.uniform(k1, (B, N, 2), jnp.float32, minval=-1.0, maxval=1.0)
    z = jax.random.uniform(k2, (B, N, 1), jnp.float32, minval=0.5, maxval=1.5)
    pred_pts = jnp.concatenate([xy, z], axis=-1)

    depth = jax.random.uniform(k3, (B, H, W), jnp.float32, minval=0.3, maxval=1.8)
    hole = (jax.random.uniform(k4, (B, H, W), jnp.float32) > 0.3).astype(jnp.float32)
    depth = depth * hole

    loss = jax.jit(rendering_loss)(pred_pts, depth)
    jax.block_until_ready(loss)

    rd = rasterize_depth(pred_pts, H, W)
    ref = _ref_loss(rd, depth)
    assert jnp.allclose(loss, ref, rtol=1e-5, atol=1e-6), (loss, ref)

    # ---- extra check: multi-block grid + clamped boundary block + row mask ----
    B2, H2, W2 = 1, 48, 128            # total % 1024 == 0 -> no-pad path
    rd2 = jax.random.uniform(k5, (B2, H2, W2), jnp.float32, minval=0.2, maxval=2.0)
    empty = jax.random.uniform(k6, (B2, H2, W2), jnp.float32) > 0.6
    rd2 = jnp.where(empty, jnp.inf, rd2)                 # rasterizer sentinel
    d2 = jax.random.uniform(k7, (B2, H2, W2), jnp.float32, minval=0.2, maxval=2.0)
    d2 = d2 * (jax.random.uniform(k4, (B2, H2, W2), jnp.float32) > 0.2)

    loss2 = jax.jit(
        lambda a, b: masked_mse_pallas(a, b, tile_rows_max=32)  # grid=2, OOB tail
    )(rd2, d2)
    jax.block_until_ready(loss2)
    ref2 = _ref_loss(rd2, d2)
    assert jnp.allclose(loss2, ref2, rtol=1e-5, atol=1e-6), (loss2, ref2)

    print("KERNEL_OK")
</pallas_src>

<mosaic_0001>
module attributes {stable_mosaic.version = 11 : i64} {
  func.func private @main(%arg0: i32) attributes {dimension_semantics = [#tpu.dimension_semantics<core_parallel>], iteration_bounds = array<i64: 2>, tpu.core_type = #tpu.core_type<sc_scalar_subcore>, window_params = []} {
    return
  }
}

module attributes {stable_mosaic.version = 11 : i64} {
  func.func private @main(%arg0: i32) attributes {dimension_semantics = [#tpu.dimension_semantics<core_parallel>], iteration_bounds = array<i64: 2>, tpu.core_type = #tpu.core_type<sc_scalar_subcore>, window_params = []} {
    return
  }
}

module attributes {stable_mosaic.version = 11 : i64} {
  func.func @kernel(%arg0: i32, %arg1: memref<8x128xf32, #tpu.memory_space<vmem>>, %arg2: memref<8x128xf32, #tpu.memory_space<vmem>>, %arg3: memref<1x8x128xf32, #tpu.memory_space<vmem>>, %arg4: memref<1x8x128xf32, #tpu.memory_space<vmem>>) attributes {dimension_semantics = [#tpu.dimension_semantics<parallel>], iteration_bounds = array<i64: 1>, scalar_prefetch = 0 : i64, scratch_operands = 0 : i64, tpu.core_type = #tpu.core_type<tc>, window_params = [{transform_indices = @transform_0, window_bounds = array<i64: 8, 128>}, {transform_indices = @transform_1, window_bounds = array<i64: 8, 128>}, {transform_indices = @transform_2, window_bounds = array<i64: 1, 8, 128>}, {transform_indices = @transform_3, window_bounds = array<i64: 1, 8, 128>}]} {
    %c0 = arith.constant 0 : index
    %c0_0 = arith.constant 0 : index
    %0 = vector.load %arg1[%c0, %c0_0] : memref<8x128xf32, #tpu.memory_space<vmem>>, vector<8x128xf32>
    %c0_1 = arith.constant 0 : index
    %c0_2 = arith.constant 0 : index
    %1 = vector.load %arg2[%c0_1, %c0_2] : memref<8x128xf32, #tpu.memory_space<vmem>>, vector<8x128xf32>
    %cst = arith.constant 0x7F800000 : f32
    %2 = vector.broadcast %cst : f32 to vector<8x128xf32>
    %3 = arith.cmpf olt, %0, %2 : vector<8x128xf32>
    %cst_3 = arith.constant 0.000000e+00 : f32
    %4 = vector.broadcast %cst_3 : f32 to vector<8x128xf32>
    %5 = arith.cmpf ogt, %0, %4 : vector<8x128xf32>
    %6 = arith.andi %3, %5 : vector<8x128xi1>
    %cst_4 = arith.constant 0.000000e+00 : f32
    %7 = vector.broadcast %cst_4 : f32 to vector<8x128xf32>
    %8 = arith.cmpf ogt, %1, %7 : vector<8x128xf32>
    %9 = arith.andi %6, %8 : vector<8x128xi1>
    %10 = arith.subf %0, %1 : vector<8x128xf32>
    %11 = arith.mulf %10, %10 : vector<8x128xf32>
    %cst_5 = arith.constant 0.000000e+00 : f32
    %12 = vector.broadcast %cst_5 : f32 to vector<8x128xf32>
    %13 = arith.select %9, %11, %12 : vector<8x128xi1>, vector<8x128xf32>
    %14 = arith.extui %9 : vector<8x128xi1> to vector<8x128xi32>
    %15 = arith.sitofp %14 : vector<8x128xi32> to vector<8x128xf32>
    %16 = vector.shape_cast %13 : vector<8x128xf32> to vector<1x8x128xf32>
    %cst_6 = arith.constant dense<0.000000e+00> : vector<8x128xf32>
    %17 = vector.multi_reduction <add>, %16, %cst_6 [0] : vector<1x8x128xf32> to vector<8x128xf32>
    %c0_7 = arith.constant 0 : index
    %c0_8 = arith.constant 0 : index
    %c0_9 = arith.constant 0 : index
    %18 = vector.load %arg3[%c0_7, %c0_8, %c0_9] : memref<1x8x128xf32, #tpu.memory_space<vmem>>, vector<1x8x128xf32>
    %19 = vector.shape_cast %18 : vector<1x8x128xf32> to vector<8x128xf32>
    %20 = vector.shape_cast %17 : vector<8x128xf32> to vector<1x8x128xf32>
    tpu.vector_store %arg3[%c0_7, %c0_8, %c0_9], %20 {strides = array<i32>} : memref<1x8x128xf32, #tpu.memory_space<vmem>>, vector<1x8x128xf32>,
    %21 = vector.shape_cast %15 : vector<8x128xf32> to vector<1x8x128xf32>
    %cst_10 = arith.constant dense<0.000000e+00> : vector<8x128xf32>
    %22 = vector.multi_reduction <add>, %21, %cst_10 [0] : vector<1x8x128xf32> to vector<8x128xf32>
    %c0_11 = arith.constant 0 : index
    %c0_12 = arith.constant 0 : index
    %c0_13 = arith.constant 0 : index
    %23 = vector.load %arg4[%c0_11, %c0_12, %c0_13] : memref<1x8x128xf32, #tpu.memory_space<vmem>>, vector<1x8x128xf32>
    %24 = vector.shape_cast %23 : vector<1x8x128xf32> to vector<8x128xf32>
    %25 = vector.shape_cast %22 : vector<8x128xf32> to vector<1x8x128xf32>
    tpu.vector_store %arg4[%c0_11, %c0_12, %c0_13], %25 {strides = array<i32>} : memref<1x8x128xf32, #tpu.memory_space<vmem>>, vector<1x8x128xf32>,
    return
  }
  func.func @transform_0(%arg0: i32) -> (i32, i32) {
    %c0_i32 = arith.constant 0 : i32
    %c0_i32_0 = arith.constant 0 : i32
    return %arg0, %c0_i32 : i32, i32
  }
  func.func @transform_1(%arg0: i32) -> (i32, i32) {
    %c0_i32 = arith.constant 0 : i32
    %c0_i32_0 = arith.constant 0 : i32
    return %arg0, %c0_i32 : i32, i32
  }
  func.func @transform_2(%arg0: i32) -> (i32, i32, i32) {
    %c0_i32 = arith.constant 0 : i32
    %c0_i32_0 = arith.constant 0 : i32
    %c0_i32_1 = arith.constant 0 : i32
    return %arg0, %c0_i32, %c0_i32_0 : i32, i32, i32
  }
  func.func @transform_3(%arg0: i32) -> (i32, i32, i32) {
    %c0_i32 = arith.constant 0 : i32
    %c0_i32_0 = arith.constant 0 : i32
    %c0_i32_1 = arith.constant 0 : i32
    return %arg0, %c0_i32, %c0_i32_0 : i32, i32, i32
  }
}

</mosaic_0001>

<bundles_post_ra>
// kernel: rendering_loss.1
= control target key start
LH: loop header
LB: loop body
LE: loop exit
PB: predicated region body
PF: predicated region fallthrough
CT: control target
= control target key end

     0   :  { %v39_v4 = vmov 0.0   ;;  %s72_s0 = inlined_call_operand.vmem [shape: f32[8,128], index: 0, kind: input, shape index: {}]   ;;  %s73_s1 = inlined_call_operand.vmem [shape: f32[8,128], index: 1, kind: input, shape index: {}]   ;;  %s74_s3 = inlined_call_operand.vmem [shape: f32[1,8,128], index: 3, kind: output, shape index: {1}]   ;;  %s75_s2 = inlined_call_operand.vmem [shape: f32[1,8,128], index: 2, kind: output, shape index: {0}]  }
   0x1   :  { %v13_v0 = vld [vmem:[%s72_s0] sm:$0xff] }
   0x2   :  { %v14_v1 = vld [vmem:[%s73_s1] sm:$0xff]  ;;  %vm15_vm0 = vcmp.lt.f32.partialorder %v13_v0, inf  ;;  %vm16_vm1 = vcmp.gt.f32.partialorder %v13_v0, 0.0 }
   0x3   :  { %vm18_vm2 = vcmp.gt.f32.partialorder %v14_v1, 0.0  ;;  %v20_v2 = vsub.f32 %v13_v0, %v14_v1  ;;  %vm17_vm3 = vmand %vm15_vm0, %vm16_vm1 }
   0x4   :  { %vm19_vm4 = vmand %vm17_vm3, %vm18_vm2 }
   0x5   :  { %v21_v3 = vmul.f32 %v20_v2, %v20_v2  ;;  %v37_v5 = vsel %vm19_vm4, 1.0, %v39_v4 }
   0x6   :  { %28 = vst [vmem:[%s74_s3] sm:$0xff] %v37_v5 }
   0x7   :  { %v22_v6 = vsel %vm19_vm4, %v21_v3, 0.0 }
   0x8   :  { %26 = vst [vmem:[%s75_s2] sm:$0xff] %v22_v6 }

</bundles_post_ra>
